<compile_context>
chip_gen: v6e
topology: v6e:2x2x1
jax: 0.10.0
libtpu: 0.0.40
codegen_flags: <defaults>
</compile_context>

<pallas_src>
import jax
import jax.numpy as jnp
from jax import lax
from jax.experimental import pallas as pl
from jax.experimental.pallas import tpu as pltpu

EPS = 1e-5                      # torch.nn.LayerNorm default
VMEM_LIMIT = 32 * 1024 * 1024   # raise scoped VMEM a bit; <= physical on all generations


# --------------------------------------------------------------------------- kernels
def _ln_channels(x, gamma, beta):
    """LayerNorm over the channel (sublane) axis of a (C, TILE_HW) f32 block."""
    c = x.shape[0]
    s1 = jnp.sum(x, axis=0, keepdims=True)
    s2 = jnp.sum(x * x, axis=0, keepdims=True)
    mean = s1 * (1.0 / c)
    var = s2 * (1.0 / c) - mean * mean          # single-pass biased variance (matches torch)
    inv = lax.rsqrt(var + EPS)
    return (x - mean) * inv * gamma + beta


def _ln_pos_qkv_kernel(x_ref, pos_ref, g1_ref, be1_ref, wqkv_ref, bqkv_ref,
                       q_ref, k_ref, v_ref):
    # x_ref / pos_ref / outputs: (1, C, TILE_HW); wqkv: (3, C, C); bqkv: (3, C, 1)
    x = x_ref[0].astype(jnp.float32)
    src2 = _ln_channels(x, g1_ref[...].astype(jnp.float32),
                        be1_ref[...].astype(jnp.float32))
    qk_in = src2 + pos_ref[0].astype(jnp.float32)          # with_pos_embed (q = k)
    wq = wqkv_ref[0].astype(jnp.float32)
    wk = wqkv_ref[1].astype(jnp.float32)
    wv = wqkv_ref[2].astype(jnp.float32)
    q = jnp.dot(wq, qk_in, preferred_element_type=jnp.float32) + bqkv_ref[0].astype(jnp.float32)
    k = jnp.dot(wk, qk_in, preferred_element_type=jnp.float32) + bqkv_ref[1].astype(jnp.float32)
    v = jnp.dot(wv, src2, preferred_element_type=jnp.float32) + bqkv_ref[2].astype(jnp.float32)
    q_ref[0] = q.astype(q_ref.dtype)
    k_ref[0] = k.astype(k_ref.dtype)
    v_ref[0] = v.astype(v_ref.dtype)


def _attention_kernel(q_ref, k_ref, v_ref, o_ref):
    # refs: (1, head_dim, T, S) channels-first slab for one (batch, head).
    head_dim = q_ref.shape[1]
    t_len = q_ref.shape[2]
    scale = 1.0 / float(head_dim) ** 0.5
    # TODO(synk): key_padding_mask and attention dropout not implemented
    #             (the test passes mask=None; dropout is identity in eval mode).
    for t in range(t_len):                      # static unroll; time_length is small/static
        q_t = q_ref[0, :, t, :].astype(jnp.float32)         # (hd, S)
        k_t = k_ref[0, :, t, :].astype(jnp.float32)
        v_t = v_ref[0, :, t, :].astype(jnp.float32)
        # logits[i, j] = sum_c q[c, i] * k[c, j]
        logits = lax.dot_general(q_t, k_t, (((0,), (0,)), ((), ())),
                                 preferred_element_type=jnp.float32) * scale
        m = jnp.max(logits, axis=-1, keepdims=True)
        p = jnp.exp(logits - m)
        attn = p / jnp.sum(p, axis=-1, keepdims=True)
        # out[c, i] = sum_j v[c, j] * attn[i, j]
        out_t = lax.dot_general(v_t, attn, (((1,), (1,)), ((), ())),
                                preferred_element_type=jnp.float32)
        o_ref[0, :, t, :] = out_t.astype(o_ref.dtype)


def _proj_ffn_kernel(vals_ref, x_ref, wo_ref, bo_ref, g2_ref, be2_ref,
                     w1_ref, fb1_ref, w2_ref, fb2_ref, o_ref):
    vals = vals_ref[0].astype(jnp.float32)      # (C, TILE_HW)
    x = x_ref[0].astype(jnp.float32)
    # output projection + residual 1 (dropout1 is identity in eval mode)
    attn_out = jnp.dot(wo_ref[...].astype(jnp.float32), vals,
                       preferred_element_type=jnp.float32) + bo_ref[...].astype(jnp.float32)
    enc = x + attn_out
    # norm2 + feed-forward + residual 2 (dropout / dropout2 are identity in eval mode)
    src2 = _ln_channels(enc, g2_ref[...].astype(jnp.float32),
                        be2_ref[...].astype(jnp.float32))
    h = jnp.dot(w1_ref[...].astype(jnp.float32), src2,
                preferred_element_type=jnp.float32) + fb1_ref[...].astype(jnp.float32)
    h = jnp.maximum(h, 0.0)                     # ReLU
    y = jnp.dot(w2_ref[...].astype(jnp.float32), h,
                preferred_element_type=jnp.float32) + fb2_ref[...].astype(jnp.float32)
    o_ref[0] = (enc + y).astype(o_ref.dtype)


# --------------------------------------------------------------------------- wrapper
def _pick_tile_hw(hw, c, f, budget_bytes=8 << 20):
    """Largest lane-dense spatial tile (multiple of 128) dividing hw that fits the budget."""
    if hw % 128 != 0:
        # A block equal to the full trailing dim is always legal; fine for small inputs.
        # TODO(synk): pad H*W to a multiple of 128 for large, non-aligned spatial sizes.
        return hw
    # f32 bytes per lane column resident in the heaviest (FFN) kernel:
    # 3 io streams x 2 buffers x C rows + FFN hidden (F rows) + norm temporaries (~C rows).
    per_col = 4 * (3 * 2 * c + f + c)
    tile = min(hw, max(128, (budget_bytes // per_col) // 128 * 128))
    while hw % tile:
        tile -= 128
    return tile


def transformer_encoder_layer(encoder, pos, params, *, num_heads, mask=None):
    """Forward pass of TransformerEncoderLayer_Normal (inference mode).

    encoder: (B, C, T, S) channels-first; pos: same shape or None; mask must be None.
    """
    assert mask is None  # TODO(synk): key_padding_mask branch not implemented
    B, C, T, S = encoder.shape
    assert C % num_heads == 0
    hd = C // num_heads
    F = params["w1"].shape[0]
    HW = T * S
    dtype = encoder.dtype

    tile = _pick_tile_hw(HW, C, F)
    n_tiles = HW // tile

    # Free reshapes only (no transposes): (B, C, T, S) -> (B, C, H*W)
    x = encoder.reshape(B, C, HW)
    pos_r = (pos if pos is not None else jnp.zeros_like(encoder)).reshape(B, C, HW)

    ln1_g = params["ln1_g"].reshape(C, 1).astype(dtype)
    ln1_b = params["ln1_b"].reshape(C, 1).astype(dtype)
    ln2_g = params["ln2_g"].reshape(C, 1).astype(dtype)
    ln2_b = params["ln2_b"].reshape(C, 1).astype(dtype)
    wqkv = jnp.stack([params["wq"], params["wk"], params["wv"]]).astype(dtype)          # (3,C,C)
    bqkv = jnp.stack([params["bq"], params["bk"], params["bv"]]).reshape(3, C, 1).astype(dtype)
    wo = params["wo"].astype(dtype)
    bo = params["bo"].reshape(C, 1).astype(dtype)
    w1 = params["w1"].astype(dtype)
    fb1 = params["b1"].reshape(F, 1).astype(dtype)
    w2 = params["w2"].astype(dtype)
    fb2 = params["b2"].reshape(C, 1).astype(dtype)

    row_spec = pl.BlockSpec((1, C, tile), lambda b, j: (b, 0, j))
    cvec_spec = pl.BlockSpec((C, 1), lambda b, j: (0, 0))
    cparams = pltpu.CompilerParams(
        dimension_semantics=("parallel", "parallel"),
        vmem_limit_bytes=VMEM_LIMIT)

    # ---- kernel 1: norm1 + pos-add + grouped qkv projection -------------------------
    q, k, v = pl.pallas_call(
        _ln_pos_qkv_kernel,
        out_shape=[jax.ShapeDtypeStruct((B, C, HW), dtype)] * 3,
        grid_spec=pltpu.PrefetchScalarGridSpec(
            num_scalar_prefetch=0,
            grid=(B, n_tiles),
            in_specs=[
                row_spec,                                          # x
                row_spec,                                          # pos
                cvec_spec,                                         # ln1 gamma
                cvec_spec,                                         # ln1 beta
                pl.BlockSpec((3, C, C), lambda b, j: (0, 0, 0)),   # Wq/Wk/Wv
                pl.BlockSpec((3, C, 1), lambda b, j: (0, 0, 0)),   # bq/bk/bv
            ],
            out_specs=[row_spec] * 3,
        ),
        compiler_params=cparams,
    )(x, pos_r, ln1_g, ln1_b, wqkv, bqkv)

    # ---- kernel 2: per-(batch, head) attention over S within each time slice --------
    head_spec = pl.BlockSpec((1, hd, T, S), lambda b, h: (b, h, 0, 0))
    vals = pl.pallas_call(
        _attention_kernel,
        out_shape=jax.ShapeDtypeStruct((B, C, T, S), dtype),
        grid_spec=pltpu.PrefetchScalarGridSpec(
            num_scalar_prefetch=0,
            grid=(B, num_heads),
            in_specs=[head_spec, head_spec, head_spec],
            out_specs=head_spec,
        ),
        compiler_params=cparams,
    )(q.reshape(B, C, T, S), k.reshape(B, C, T, S), v.reshape(B, C, T, S))

    # ---- kernel 3: out-proj + residual + norm2 + FFN + residual ----------------------
    out = pl.pallas_call(
        _proj_ffn_kernel,
        out_shape=jax.ShapeDtypeStruct((B, C, HW), dtype),
        grid_spec=pltpu.PrefetchScalarGridSpec(
            num_scalar_prefetch=0,
            grid=(B, n_tiles),
            in_specs=[
                row_spec,                                          # attention values
                row_spec,                                          # residual stream x
                pl.BlockSpec((C, C), lambda b, j: (0, 0)),         # Wo
                cvec_spec,                                         # bo
                cvec_spec,                                         # ln2 gamma
                cvec_spec,                                         # ln2 beta
                pl.BlockSpec((F, C), lambda b, j: (0, 0)),         # W1
                pl.BlockSpec((F, 1), lambda b, j: (0, 0)),         # b1
                pl.BlockSpec((C, F), lambda b, j: (0, 0)),         # W2
                cvec_spec,                                         # b2
            ],
            out_specs=row_spec,
        ),
        compiler_params=cparams,
    )(vals.reshape(B, C, HW), x, wo, bo, ln2_g, ln2_b, w1, fb1, w2, fb2)

    return out.reshape(B, C, T, S)


# --------------------------------------------------------------------------- reference
def _reference_forward(x, pos, params, *, num_heads):
    """Plain-JAX reference mirroring the PyTorch module (eval mode)."""
    B, C, T, S = x.shape
    hd = C // num_heads
    hp = lax.Precision.HIGHEST

    def ln(z, g, b):
        zt = jnp.transpose(z, (0, 2, 3, 1))
        m = jnp.mean(zt, axis=-1, keepdims=True)
        v = jnp.mean((zt - m) ** 2, axis=-1, keepdims=True)
        o = (zt - m) / jnp.sqrt(v + EPS) * g + b
        return jnp.transpose(o, (0, 3, 1, 2))

    def conv1x1(z, w, b):
        return jnp.einsum("oc,bcts->bots", w, z, precision=hp) + b[None, :, None, None]

    src2 = ln(x, params["ln1_g"], params["ln1_b"])
    qk_in = src2 + pos
    q = conv1x1(qk_in, params["wq"], params["bq"])
    k = conv1x1(qk_in, params["wk"], params["bk"])
    v = conv1x1(src2, params["wv"], params["bv"])

    def heads(z):
        return jnp.transpose(z.reshape(B, num_heads, hd, T, S), (0, 1, 3, 4, 2))

    qh, kh, vh = heads(q), heads(k), heads(v)                       # (B, H, T, S, hd)
    logits = jnp.einsum("bhtqc,bhtkc->bhtqk", qh, kh, precision=hp) / (hd ** 0.5)
    attn = jax.nn.softmax(logits, axis=-1)
    vals = jnp.einsum("bhtqk,bhtkc->bhtqc", attn, vh, precision=hp)
    vals = jnp.transpose(vals, (0, 1, 4, 2, 3)).reshape(B, C, T, S)

    enc = x + conv1x1(vals, params["wo"], params["bo"])
    src2 = ln(enc, params["ln2_g"], params["ln2_b"])
    h = jax.nn.relu(conv1x1(src2, params["w1"], params["b1"]))
    y = conv1x1(h, params["w2"], params["b2"])
    return enc + y


# --------------------------------------------------------------------------- test
if __name__ == "__main__":
    key = jax.random.PRNGKey(0)
    keys = jax.random.split(key, 16)

    # d_model=32, nhead=4 (head_dim=8), dim_feedforward=64, time_length=16, seq_length=8
    B, C, NH, T, S, F = 2, 32, 4, 16, 8, 64
    dtype = jnp.float32

    x = jax.random.normal(keys[0], (B, C, T, S), dtype)
    pos = 0.5 * jax.random.normal(keys[1], (B, C, T, S), dtype)

    def xavier(k, shape):
        fan_out, fan_in = shape
        lim = (6.0 / (fan_in + fan_out)) ** 0.5
        return jax.random.uniform(k, shape, dtype, -lim, lim)

    params = dict(
        ln1_g=jnp.ones((C,), dtype) + 0.05 * jax.random.normal(keys[2], (C,), dtype),
        ln1_b=0.05 * jax.random.normal(keys[3], (C,), dtype),
        ln2_g=jnp.ones((C,), dtype) + 0.05 * jax.random.normal(keys[4], (C,), dtype),
        ln2_b=0.05 * jax.random.normal(keys[5], (C,), dtype),
        wq=xavier(keys[6], (C, C)), bq=jnp.zeros((C,), dtype),
        wk=xavier(keys[7], (C, C)), bk=jnp.zeros((C,), dtype),
        wv=xavier(keys[8], (C, C)), bv=jnp.zeros((C,), dtype),
        wo=xavier(keys[9], (C, C)), bo=jnp.zeros((C,), dtype),
        w1=xavier(keys[10], (F, C)), b1=0.02 * jax.random.normal(keys[11], (F,), dtype),
        w2=xavier(keys[12], (C, F)), b2=0.02 * jax.random.normal(keys[13], (C,), dtype),
    )

    out = transformer_encoder_layer(x, pos, params, num_heads=NH, mask=None)
    out = jax.block_until_ready(out)

    ref = _reference_forward(x, pos, params, num_heads=NH)
    max_err = float(jnp.max(jnp.abs(out - ref)))
    assert out.shape == x.shape
    assert jnp.allclose(out, ref, atol=5e-4, rtol=5e-4), \
        f"mismatch vs reference (max abs err {max_err:.3e})"

    print("KERNEL_OK")
</pallas_src>

<mosaic_0001>
module attributes {stable_mosaic.version = 11 : i64} {
  func.func @_ln_pos_qkv_kernel(%arg0: i32, %arg1: i32, %arg2: memref<1x32x128xf32, #tpu.memory_space<vmem>>, %arg3: memref<1x32x128xf32, #tpu.memory_space<vmem>>, %arg4: memref<32x1xf32, #tpu.memory_space<vmem>>, %arg5: memref<32x1xf32, #tpu.memory_space<vmem>>, %arg6: memref<3x32x32xf32, #tpu.memory_space<vmem>>, %arg7: memref<3x32x1xf32, #tpu.memory_space<vmem>>, %arg8: memref<1x32x128xf32, #tpu.memory_space<vmem>>, %arg9: memref<1x32x128xf32, #tpu.memory_space<vmem>>, %arg10: memref<1x32x128xf32, #tpu.memory_space<vmem>>) attributes {dimension_semantics = [#tpu.dimension_semantics<parallel>, #tpu.dimension_semantics<parallel>], iteration_bounds = array<i64: 2, 1>, scalar_prefetch = 0 : i64, scratch_operands = 0 : i64, tpu.core_type = #tpu.core_type<tc>, window_params = [{transform_indices = @transform_0, window_bounds = array<i64: 1, 32, 128>}, {transform_indices = @transform_1, window_bounds = array<i64: 1, 32, 128>}, {pipeline_mode = #tpu.pipeline_mode<synchronous>, transform_indices = @transform_2, window_bounds = array<i64: 32, 1>}, {pipeline_mode = #tpu.pipeline_mode<synchronous>, transform_indices = @transform_3, window_bounds = array<i64: 32, 1>}, {pipeline_mode = #tpu.pipeline_mode<synchronous>, transform_indices = @transform_4, window_bounds = array<i64: 3, 32, 32>}, {pipeline_mode = #tpu.pipeline_mode<synchronous>, transform_indices = @transform_5, window_bounds = array<i64: 3, 32, 1>}, {transform_indices = @transform_6, window_bounds = array<i64: 1, 32, 128>}, {transform_indices = @transform_7, window_bounds = array<i64: 1, 32, 128>}, {transform_indices = @transform_8, window_bounds = array<i64: 1, 32, 128>}]} {
    %c0 = arith.constant 0 : index
    %c0_0 = arith.constant 0 : index
    %c0_1 = arith.constant 0 : index
    %0 = vector.load %arg2[%c0, %c0_0, %c0_1] : memref<1x32x128xf32, #tpu.memory_space<vmem>>, vector<1x32x128xf32>
    %1 = vector.shape_cast %0 : vector<1x32x128xf32> to vector<32x128xf32>
    %c0_2 = arith.constant 0 : index
    %c0_3 = arith.constant 0 : index
    %2 = vector.load %arg4[%c0_2, %c0_3] : memref<32x1xf32, #tpu.memory_space<vmem>>, vector<32x1xf32>
    %c0_4 = arith.constant 0 : index
    %c0_5 = arith.constant 0 : index
    %3 = vector.load %arg5[%c0_4, %c0_5] : memref<32x1xf32, #tpu.memory_space<vmem>>, vector<32x1xf32>
    %cst = arith.constant dense<0.000000e+00> : vector<128xf32>
    %4 = vector.multi_reduction <add>, %1, %cst [0] : vector<32x128xf32> to vector<128xf32>
    %5 = vector.shape_cast %4 : vector<128xf32> to vector<1x128xf32>
    %6 = arith.mulf %1, %1 : vector<32x128xf32>
    %cst_6 = arith.constant dense<0.000000e+00> : vector<128xf32>
    %7 = vector.multi_reduction <add>, %6, %cst_6 [0] : vector<32x128xf32> to vector<128xf32>
    %8 = vector.shape_cast %7 : vector<128xf32> to vector<1x128xf32>
    %cst_7 = arith.constant 3.125000e-02 : f32
    %9 = vector.broadcast %cst_7 : f32 to vector<1x128xf32>
    %10 = arith.mulf %5, %9 : vector<1x128xf32>
    %cst_8 = arith.constant 3.125000e-02 : f32
    %11 = vector.broadcast %cst_8 : f32 to vector<1x128xf32>
    %12 = arith.mulf %8, %11 : vector<1x128xf32>
    %13 = arith.mulf %10, %10 : vector<1x128xf32>
    %14 = arith.subf %12, %13 : vector<1x128xf32>
    %cst_9 = arith.constant 9.99999974E-6 : f32
    %15 = vector.broadcast %cst_9 : f32 to vector<1x128xf32>
    %16 = arith.addf %14, %15 : vector<1x128xf32>
    %17 = math.rsqrt %16 : vector<1x128xf32>
    %18 = vector.broadcast %10 : vector<1x128xf32> to vector<32x128xf32>
    %19 = arith.subf %1, %18 : vector<32x128xf32>
    %20 = vector.broadcast %17 : vector<1x128xf32> to vector<32x128xf32>
    %21 = arith.mulf %19, %20 : vector<32x128xf32>
    %22 = vector.broadcast %2 : vector<32x1xf32> to vector<32x128xf32>
    %23 = arith.mulf %21, %22 : vector<32x128xf32>
    %24 = vector.broadcast %3 : vector<32x1xf32> to vector<32x128xf32>
    %25 = arith.addf %23, %24 : vector<32x128xf32>
    %c0_10 = arith.constant 0 : index
    %c0_11 = arith.constant 0 : index
    %c0_12 = arith.constant 0 : index
    %26 = vector.load %arg3[%c0_10, %c0_11, %c0_12] : memref<1x32x128xf32, #tpu.memory_space<vmem>>, vector<1x32x128xf32>
    %27 = vector.shape_cast %26 : vector<1x32x128xf32> to vector<32x128xf32>
    %28 = arith.addf %25, %27 : vector<32x128xf32>
    %c0_13 = arith.constant 0 : index
    %c0_14 = arith.constant 0 : index
    %c0_15 = arith.constant 0 : index
    %29 = vector.load %arg6[%c0_13, %c0_14, %c0_15] : memref<3x32x32xf32, #tpu.memory_space<vmem>>, vector<1x32x32xf32>
    %30 = vector.shape_cast %29 : vector<1x32x32xf32> to vector<32x32xf32>
    %c1 = arith.constant 1 : index
    %c0_16 = arith.constant 0 : index
    %c0_17 = arith.constant 0 : index
    %31 = vector.load %arg6[%c1, %c0_16, %c0_17] : memref<3x32x32xf32, #tpu.memory_space<vmem>>, vector<1x32x32xf32>
    %32 = vector.shape_cast %31 : vector<1x32x32xf32> to vector<32x32xf32>
    %c2 = arith.constant 2 : index
    %c0_18 = arith.constant 0 : index
    %c0_19 = arith.constant 0 : index
    %33 = vector.load %arg6[%c2, %c0_18, %c0_19] : memref<3x32x32xf32, #tpu.memory_space<vmem>>, vector<1x32x32xf32>
    %34 = vector.shape_cast %33 : vector<1x32x32xf32> to vector<32x32xf32>
    %cst_20 = arith.constant dense<0.000000e+00> : vector<32x128xf32>
    %35 = tpu.matmul %30, %28, %cst_20 {dimension_numbers = #tpu.dot_dimension_numbers<[1], [0], [0], [1], [0, 0, 1, 1], [], []>} : vector<32x32xf32>, vector<32x128xf32>, vector<32x128xf32> -> vector<32x128xf32>
    %c0_21 = arith.constant 0 : index
    %c0_22 = arith.constant 0 : index
    %c0_23 = arith.constant 0 : index
    %36 = vector.load %arg7[%c0_21, %c0_22, %c0_23] : memref<3x32x1xf32, #tpu.memory_space<vmem>>, vector<1x32x1xf32>
    %37 = vector.shape_cast %36 : vector<1x32x1xf32> to vector<32x1xf32>
    %38 = vector.broadcast %37 : vector<32x1xf32> to vector<32x128xf32>
    %39 = arith.addf %35, %38 : vector<32x128xf32>
    %cst_24 = arith.constant dense<0.000000e+00> : vector<32x128xf32>
    %40 = tpu.matmul %32, %28, %cst_24 {dimension_numbers = #tpu.dot_dimension_numbers<[1], [0], [0], [1], [0, 0, 1, 1], [], []>} : vector<32x32xf32>, vector<32x128xf32>, vector<32x128xf32> -> vector<32x128xf32>
    %c1_25 = arith.constant 1 : index
    %c0_26 = arith.constant 0 : index
    %c0_27 = arith.constant 0 : index
    %41 = vector.load %arg7[%c1_25, %c0_26, %c0_27] : memref<3x32x1xf32, #tpu.memory_space<vmem>>, vector<1x32x1xf32>
    %42 = vector.shape_cast %41 : vector<1x32x1xf32> to vector<32x1xf32>
    %43 = vector.broadcast %42 : vector<32x1xf32> to vector<32x128xf32>
    %44 = arith.addf %40, %43 : vector<32x128xf32>
    %cst_28 = arith.constant dense<0.000000e+00> : vector<32x128xf32>
    %45 = tpu.matmul %34, %25, %cst_28 {dimension_numbers = #tpu.dot_dimension_numbers<[1], [0], [0], [1], [0, 0, 1, 1], [], []>} : vector<32x32xf32>, vector<32x128xf32>, vector<32x128xf32> -> vector<32x128xf32>
    %c2_29 = arith.constant 2 : index
    %c0_30 = arith.constant 0 : index
    %c0_31 = arith.constant 0 : index
    %46 = vector.load %arg7[%c2_29, %c0_30, %c0_31] : memref<3x32x1xf32, #tpu.memory_space<vmem>>, vector<1x32x1xf32>
    %47 = vector.shape_cast %46 : vector<1x32x1xf32> to vector<32x1xf32>
    %48 = vector.broadcast %47 : vector<32x1xf32> to vector<32x128xf32>
    %49 = arith.addf %45, %48 : vector<32x128xf32>
    %c0_32 = arith.constant 0 : index
    %c0_33 = arith.constant 0 : index
    %c0_34 = arith.constant 0 : index
    %50 = vector.load %arg8[%c0_32, %c0_33, %c0_34] : memref<1x32x128xf32, #tpu.memory_space<vmem>>, vector<1x32x128xf32>
    %51 = vector.shape_cast %50 : vector<1x32x128xf32> to vector<32x128xf32>
    %52 = vector.shape_cast %39 : vector<32x128xf32> to vector<1x32x128xf32>
    tpu.vector_store %arg8[%c0_32, %c0_33, %c0_34], %52 {strides = array<i32>} : memref<1x32x128xf32, #tpu.memory_space<vmem>>, vector<1x32x128xf32>,
    %c0_35 = arith.constant 0 : index
    %c0_36 = arith.constant 0 : index
    %c0_37 = arith.constant 0 : index
    %53 = vector.load %arg9[%c0_35, %c0_36, %c0_37] : memref<1x32x128xf32, #tpu.memory_space<vmem>>, vector<1x32x128xf32>
    %54 = vector.shape_cast %53 : vector<1x32x128xf32> to vector<32x128xf32>
    %55 = vector.shape_cast %44 : vector<32x128xf32> to vector<1x32x128xf32>
    tpu.vector_store %arg9[%c0_35, %c0_36, %c0_37], %55 {strides = array<i32>} : memref<1x32x128xf32, #tpu.memory_space<vmem>>, vector<1x32x128xf32>,
    %c0_38 = arith.constant 0 : index
    %c0_39 = arith.constant 0 : index
    %c0_40 = arith.constant 0 : index
    %56 = vector.load %arg10[%c0_38, %c0_39, %c0_40] : memref<1x32x128xf32, #tpu.memory_space<vmem>>, vector<1x32x128xf32>
    %57 = vector.shape_cast %56 : vector<1x32x128xf32> to vector<32x128xf32>
    %58 = vector.shape_cast %49 : vector<32x128xf32> to vector<1x32x128xf32>
    tpu.vector_store %arg10[%c0_38, %c0_39, %c0_40], %58 {strides = array<i32>} : memref<1x32x128xf32, #tpu.memory_space<vmem>>, vector<1x32x128xf32>,
    return
  }
  func.func @transform_0(%arg0: i32, %arg1: i32) -> (i32, i32, i32) {
    %c0_i32 = arith.constant 0 : i32
    %c0_i32_0 = arith.constant 0 : i32
    return %arg0, %c0_i32, %arg1 : i32, i32, i32
  }
  func.func @transform_1(%arg0: i32, %arg1: i32) -> (i32, i32, i32) {
    %c0_i32 = arith.constant 0 : i32
    %c0_i32_0 = arith.constant 0 : i32
    return %arg0, %c0_i32, %arg1 : i32, i32, i32
  }
  func.func @transform_2(%arg0: i32, %arg1: i32) -> (i32, i32) {
    %c0_i32 = arith.constant 0 : i32
    %c0_i32_0 = arith.constant 0 : i32
    %c0_i32_1 = arith.constant 0 : i32
    return %c0_i32, %c0_i32_0 : i32, i32
  }
  func.func @transform_3(%arg0: i32, %arg1: i32) -> (i32, i32) {
    %c0_i32 = arith.constant 0 : i32
    %c0_i32_0 = arith.constant 0 : i32
    %c0_i32_1 = arith.constant 0 : i32
    return %c0_i32, %c0_i32_0 : i32, i32
  }
  func.func @transform_4(%arg0: i32, %arg1: i32) -> (i32, i32, i32) {
    %c0_i32 = arith.constant 0 : i32
    %c0_i32_0 = arith.constant 0 : i32
    %c0_i32_1 = arith.constant 0 : i32
    %c0_i32_2 = arith.constant 0 : i32
    return %c0_i32, %c0_i32_0, %c0_i32_1 : i32, i32, i32
  }
  func.func @transform_5(%arg0: i32, %arg1: i32) -> (i32, i32, i32) {
    %c0_i32 = arith.constant 0 : i32
    %c0_i32_0 = arith.constant 0 : i32
    %c0_i32_1 = arith.constant 0 : i32
    %c0_i32_2 = arith.constant 0 : i32
    return %c0_i32, %c0_i32_0, %c0_i32_1 : i32, i32, i32
  }
  func.func @transform_6(%arg0: i32, %arg1: i32) -> (i32, i32, i32) {
    %c0_i32 = arith.constant 0 : i32
    %c0_i32_0 = arith.constant 0 : i32
    return %arg0, %c0_i32, %arg1 : i32, i32, i32
  }
  func.func @transform_7(%arg0: i32, %arg1: i32) -> (i32, i32, i32) {
    %c0_i32 = arith.constant 0 : i32
    %c0_i32_0 = arith.constant 0 : i32
    return %arg0, %c0_i32, %arg1 : i32, i32, i32
  }
  func.func @transform_8(%arg0: i32, %arg1: i32) -> (i32, i32, i32) {
    %c0_i32 = arith.constant 0 : i32
    %c0_i32_0 = arith.constant 0 : i32
    return %arg0, %c0_i32, %arg1 : i32, i32, i32
  }
}

</mosaic_0001>

<bundles_post_ra>
// kernel: tpu_custom_call.1
= control target key start
LH: loop header
LB: loop body
LE: loop exit
PB: predicated region body
PF: predicated region fallthrough
CT: control target
= control target key end

     0   :  { %s1912_s0 = inlined_call_operand.vmem [shape: f32[2,32,128], index: 0, kind: input, shape index: {}]   ;;  %s1913_s1 = inlined_call_operand.hbm [shape: f32[2,32,128], index: 1, kind: input, shape index: {}]   ;;  %s1914_s2 = inlined_call_operand.vmem [shape: f32[32,1], index: 2, kind: input, shape index: {}]   ;;  %s1915_s3 = inlined_call_operand.vmem [shape: f32[32,1], index: 3, kind: input, shape index: {}]   ;;  %s1916_s4 = inlined_call_operand.vmem [shape: f32[3,32,32], index: 4, kind: input, shape index: {}]   ;;  %s1917_s5 = inlined_call_operand.vmem [shape: f32[3,32,1], index: 5, kind: input, shape index: {}]   ;;  %s1918_s6 = inlined_call_operand.hbm [shape: f32[2,32,128], index: 6, kind: output, shape index: {0}]   ;;  %s1919_s7 = inlined_call_operand.hbm [shape: f32[2,32,128], index: 7, kind: output, shape index: {1}]   ;;  %s1920_s8 = inlined_call_operand.hbm [shape: f32[2,32,128], index: 8, kind: output, shape index: {2}]  }
   0x1   :  { %1924 = sst [smem:[#allocation15_spill]] %s1912_s0 }
   0x2   :  { %14 = vsyncpa [#allocation3], 0 }
   0x3   :  { %16 = vsyncpa [#allocation3 + $0x1], 0 }
   0x4   :  { %17 = vsyncpa [#allocation4], 0 }
   0x5   :  { %19 = vsyncpa [#allocation4 + $0x1], 0 }
   0x6   :  { %20 = vsyncpa [#allocation7], 0 }
   0x7   :  { %22 = vsyncpa [#allocation7 + $0x1], 0  ;;  %s1550_s27 = smov 0   ;;  %s1552_s28 = smov 0  }
   0x8   :  { %s1554_s29 = smov 0   ;;  %s1556_s30 = smov 0  }
   0x9   :  { %s1558_s9 = smov 0   ;;  %s1560_s10 = smov 0  }
   0xa LB: > { %1925 = sst [smem:[#allocation12_spill]] %s1490_s9  ;;  %s1581_s11 = sadd.s32 4294967295, %s1494_s10   ;;  %s1494_s10 = sphi %s1560_s10, %s28_s10   ;;  %s1490_s9 = sphi %s1558_s9, %s1939_s9   ;;  %s1486_s30 = sphi %s1556_s30, %s1938_s30   ;;  %s1482_s29 = sphi %s1554_s29, %s1942_s29   ;;  %s1478_s28 = sphi %s1552_s28, %s1941_s28   ;;  %s1474_s27 = sphi %s1550_s27, %s1940_s27  }
   0xb   : > { %s1922_s12 = sadd.s32 4294967294, %s1494_s10   ;;  %s40_s13 = sadd.s32 1, %s1490_s9 }
   0xc   : > { %s77_s14 = sadd.s32 1, %s1482_s29  ;;  %p42_p0 = scmp.ge.s32.totalorder %s40_s13, 2 }
   0xd   : > { %p84_p1 = scmp.ne.s32.totalorder %s1482_s29, %s1478_s28  ;;  %p85_p2 = scmp.eq.s32.totalorder %s1494_s10, 0 }
   0xe   : > { %p90_p3 = scmp.ne.s32.totalorder %s1478_s28, %s1474_s27  ;;  %s1944_s13 = smov (%p42_p0, %s40_s13), 0 }
   0xf   : > { %1926 = sst [smem:[#allocation13_spill]] %s1944_s13  ;;  %p1593_p4 = por %p85_p2, %p84_p1 }
  0x10   : > { %p91_p5 = scmp.eq.s32.totalorder %s1581_s11, 0  ;;  %s72_s16 = ssub.s32 %s1490_s9, %s1944_s13 }
  0x11   : > { %p200_p6 = scmp.eq.s32.totalorder %s1581_s11, 1  ;;  %p75_p7 = scmp.eq.s32.totalorder %s72_s16, 0 }
  0x12   : > { %p1601_p8 = por %p91_p5, %p90_p3  ;;  %p206_p10 = scmp.eq.s32.totalorder %s1922_s12, 1 }
  0x13   : > { %p1605_p9 = por %p200_p6, %p84_p1  ;;  %p1271_p13 = scmp.lt.s32.totalorder %s1494_s10, 2 }
  0x14   : > { %s1612_s19 = scalar_select %p75_p7, %s1482_s29, %s77_s14  }
  0x15   : > { %p1614_p11 = por %p206_p10, %p90_p3  ;;  %s305_s21 = sand.u32 1, %s1482_s29  }
  0x16   : > { %1930 = sst [smem:[#allocation14_spill]] %s1612_s19  ;;  %s1121_s22 = sshll.u32 %s305_s21, 5 }
  0x17   : > { %s1170_s23 = sshll.u32 %s1490_s9, 9  ;;  %s309_s16 = scalar_lea.vmem [#allocation2], %s1121_s22 }
  0x18   : > { %s316_s26 = scalar_lea.hbm %s1913_s1, %s1170_s23  ;;  %s317_s13 = sshll.u32 %s309_s16, 4  ;;  %s318_s13 = int_to_ptr.vmem [resolvable:$true] %s317_s13 }
  0x19   : > { %p1627_p0 = pnand %p1271_p13, %p1593_p4  ;;  %p1124_p1 = scmp.ge.s32.totalorder %s1494_s10, 1 }
  0x1a   : > { %s306_s12 = scalar_lea.sflag [#allocation3], %s305_s21  ;;  %s1343_s19 = scalar_lea.vmem %s318_s13, 512 }
  0x1b   : > { %p1332_p2 = pneg %p1627_p0  ;;  %p1344_p3 = scmp.ne.s32.totalorder %s318_s13, %s1343_s19 }
  0x1c   : > { %s1496_s9 = smov [#allocation2]  }
  0x1d   : > { %p1346_p5 = pnand %p1344_p3, %p1332_p2  ;;  %s1348_s24 = sshll.u32 %s1496_s9, 4  ;;  %s1349_s24 = int_to_ptr.vmem [resolvable:$false] %s1348_s24 }
  0x1e   : > { %s1350_s22 = scalar_lea.vmem %s1349_s24, 1024  ;;  %p1351_p7 = scmp.lt.s32.totalorder %s318_s13, %s1349_s24 }
  0x1f   : > { %p1347_p6 = pneg %p1346_p5  ;;  %p1352_p10 = scmp.lt.s32.totalorder %s1350_s22, %s1343_s19 }
  0x21   : > { %p1353_p12 = por %p1352_p10, %p1351_p7 }
  0x23   : > { %p1354_p4 = pnand %p1353_p12, %p1347_p6 }
  0x25   : > { %1357 = shalt.err (!%p1354_p4)
}
  0x26   : > { %s1497_s15 = smov 128   ;;  %s1498_s21 = smov 8  }
  0x27   : > { %1260 = dma.hbm_to_vmem [thread:$0]  (!%p1627_p0), %s316_s26, 512, %s318_s13, %s306_s12, %s1497_s15, %s1497_s15, %s1498_s21  }
  0x28   : > { %p325_p13 = scmp.lt.s32.totalorder %s1494_s10, 3 }
  0x2a   : > { %p326_p2 = pnand %p1124_p1, %p325_p13 }
  0x2b   : > { %s1640_s9 = sand.u32 (!%p326_p2), 1, %s1478_s28  }
  0x2c   : > { %329 = sbr.rel (%p326_p2) target bundleno = 458 (0x1ca), region = 44  ;;  %s1643_s19 = sshll.u32 (!%p326_p2), %s1640_s9, 5 }
  0x2d   : > { %s332_s23 = scalar_lea.sflag (!%p326_p2), [#allocation3], %s1640_s9  ;;  %s1647_s25 = scalar_lea.vmem (!%p326_p2), [#allocation2], %s1643_s19 }
  0x31   : > { %1461 = dma.done.wait (%p1601_p8), %s332_s23, 512  }
  0x32   : > { %1463 = vsyncadd (%p1601_p8), %s332_s23, 4294966784  ;;  %v1499_v0 = vmov 0   ;;  %v405_v1 = vld [vmem:[%s1915_s3 + $0x18] sm:$0xff]  ;;  %v400_v3 = vld [vmem:[%s1914_s2 + $0x10] sm:$0xff]  ;;  %vm536_vm0 = vcmask 261120   ;;  %p386_p8 = scmp.lt.s32.totalorder %s1486_s30, 1 }
  0x33   : > { %1327 = vset.pattern.permute.xlu1 %v1499_v0  ;;  %1326 = vset.pattern.permute.xlu0 %v1499_v0  ;;  %v401_v2 = vld [vmem:[%s1914_s2 + $0x18] sm:$0xff]  ;;  %v399_v4 = vld [vmem:[%s1914_s2 + $0x8] sm:$0xff]  ;;  %v404_v5 = vld [vmem:[%s1915_s3 + $0x10] sm:$0xff]  ;;  %s1933_s0 = sld [smem:[#allocation15_spill]]  ;;  %s378_s16 = scalar_lea.vmem [#allocation6], %s1643_s19 }
  0x34   : > { %483 = vperm.xlu1 %1327, %v405_v1   ;;  %459 = vperm.xlu0 %1326, %v401_v2   ;;  %v398_v6 = vld [vmem:[%s1914_s2] sm:$0xff]  ;;  %v403_v7 = vld [vmem:[%s1915_s3 + $0x8] sm:$0xff]  ;;  %v1145_v13 = vld [vmem:[%s1917_s5 + $0x30] sm:$0xff]  ;;  %s387_s12 = scalar_select %p386_p8, %s1486_s30, 1 }
  0x35   : > { %v402_v8 = vld [vmem:[%s1915_s3] sm:$0xff]  ;;  %v1144_v10 = vld [vmem:[%s1917_s5 + $0x28] sm:$0xff]  ;;  %v1146_v14 = vld [vmem:[%s1917_s5 + $0x38] sm:$0xff]  ;;  %s895_s24 = sand.u32 1, %s1581_s11   ;;  %s1776_s22 = sshll.u32 %s1486_s30, 9 }
  0x36   : > { %v1143_v9 = vld [vmem:[%s1917_s5 + $0x20] sm:$0xff]  ;;  %v513_v16 = vld [vmem:[%s1917_s5 + $0x8] sm:$0xff]  ;;  %v514_v17 = vld [vmem:[%s1917_s5 + $0x10] sm:$0xff]  ;;  %s1171_s13 = sshll.u32 %s387_s12, 5  ;;  %s1786_s17 = scalar_lea.hbm %s1919_s7, %s1776_s22 }
  0x37   : > { %v498_v11 = vld [vmem:[%s1916_s4] sm:$0xff]  ;;  %v515_v18 = vld [vmem:[%s1917_s5 + $0x18] sm:$0xff]  ;;  %v1152_v20 = vld [vmem:[%s1917_s5 + $0x48] sm:$0xff]  ;;  %s1792_s21 = scalar_lea.hbm %s1918_s6, %s1776_s22  ;;  %s1795_s23 = scalar_lea.vmem [#allocation8], %s1643_s19 }
  0x38   : > { %454 = vperm.xlu0 %1326, %v400_v3   ;;  %449 = vperm.xlu1 %1327, %v399_v4   ;;  %v1131_v12 = vld [vmem:[%s1916_s4 + $0x20] sm:$0xff]  ;;  %v1153_v21 = vld [vmem:[%s1917_s5 + $0x50] sm:$0xff]  ;;  %v1154_v22 = vld [vmem:[%s1917_s5 + $0x58] sm:$0xff]  ;;  %s1500_s11 = smov [#allocation6]  }
  0x39   : > { %1207 = vmatprep.mubr.msk.f32.mxu0 %vm536_vm0, %v498_v11  ;;  %1221 = vmatprep.mubr.msk.f32.mxu1 %vm536_vm0, %v1131_v12  ;;  %v512_v15 = vld [vmem:[%s1917_s5] sm:$0xff]  ;;  %s393_s14 = scalar_lea.vmem %s1933_s0, %s1171_s13  ;;  %v493_v61 = vld [vmem:[%s1647_s25 + $0x18] sm:$0xff]  ;;  %s371_s13 = scalar_lea.vmem [#allocation5], %s1643_s19 }
  0x3a   : > { %v1151_v19 = vld [vmem:[%s1917_s5 + $0x40] sm:$0xff]  ;;  %v395_v24 = vld [vmem:[%s393_s14 + $0x8] sm:$0xff]  ;;  %v396_v28 = vld [vmem:[%s393_s14 + $0x10] sm:$0xff]  ;;  %s915_s26 = sshll.u32 %s371_s13, 4  ;;  %s1798_s0 = scalar_lea.sflag [#allocation7], %s895_s24  ;;  %s1773_s26 = int_to_ptr.vmem [resolvable:$true] %s915_s26 }
  0x3b   : > { %v394_v23 = vld [vmem:[%s393_s14] sm:$0xff]  ;;  %v416_v27 = vmul.f32 %v395_v24, %v395_v24  ;;  %v417_v30 = vmul.f32 %v396_v28, %v396_v28  ;;  %v397_v32 = vld [vmem:[%s393_s14 + $0x18] sm:$0xff]  ;;  %s932_s14 = sshll.u32 %s378_s16, 4  ;;  %s1362_s15 = sshll.u32 %s1500_s11, 4  ;;  %s1780_s14 = int_to_ptr.vmem [resolvable:$true] %s932_s14  ;;  %s1363_s15 = int_to_ptr.vmem [resolvable:$false] %s1362_s15 }
  0x3c   : > { %478 = vperm.xlu0 %1326, %v404_v5   ;;  %444 = vperm.xlu1 %1327, %v398_v6   ;;  %v406_v25 = vadd.f32 %v395_v24, %v394_v23  ;;  %v415_v26 = vmul.f32 %v394_v23, %v394_v23  ;;  %v418_v34 = vmul.f32 %v397_v32, %v397_v32  ;;  %s1358_s30 = scalar_lea.vmem %s1780_s14, 512  ;;  %p1365_p3 = scmp.lt.s32.totalorder %s1780_s14, %s1363_s15 }
  0x3d   : > { %p1359_p12 = scmp.ne.s32.totalorder %s1780_s14, %s1358_s30 }
  0x3e   : > { %v407_v29 = vadd.f32 %v406_v25, %v396_v28  ;;  %v419_v31 = vadd.f32 %v416_v27, %v415_v26  ;;  %v500_v25 = vld [vmem:[%s1916_s4 + $0x10] sm:$0xff]  ;;  %v501_v27 = vld [vmem:[%s1916_s4 + $0x18] sm:$0xff] }
  0x3f   : > { %v1133_v26 = vld [vmem:[%s1916_s4 + $0x30] sm:$0xff]  ;;  %p1360_p0 = pnand %p1359_p12, %p1605_p9 }
  0x40   : > { %473 = vperm.xlu0 %1326, %v403_v7   ;;  %468 = vperm.xlu1 %1327, %v402_v8   ;;  %v408_v33 = vadd.f32 %v407_v29, %v397_v32  ;;  %v420_v35 = vadd.f32 %v419_v31, %v417_v30  ;;  %v1135_v29 = vld [vmem:[%s1916_s4 + $0x40] sm:$0xff]  ;;  %v1137_v30 = vld [vmem:[%s1916_s4 + $0x50] sm:$0xff]  ;;  %v1136_v31 = vld [vmem:[%s1916_s4 + $0x48] sm:$0xff] }
  0x41   : > { %p1361_p1 = pneg %p1360_p0 }
  0x42   : > { %v409_v36 = vrot.slane %v408_v33, 4  ;;  %v421_v37 = vadd.f32 %v420_v35, %v418_v34 }
  0x44   : > { %641 = vperm.xlu0 %1326, %v1143_v9   ;;  %646 = vperm.xlu1 %1327, %v1144_v10   ;;  %v410_v38 = vadd.f32 %v409_v36, %v408_v33  ;;  %v422_v39 = vrot.slane %v421_v37, 4  ;;  %v492_v10 = vld [vmem:[%s1647_s25 + $0x10] sm:$0xff] }
  0x46   : > { %v411_v40 = vrot.slane %v410_v38, 2  ;;  %v423_v41 = vadd.f32 %v422_v39, %v421_v37 }
  0x48   : > { %651 = vperm.xlu0 %1326, %v1145_v13   ;;  %656 = vperm.xlu1 %1327, %v1146_v14   ;;  %v412_v42 = vadd.f32 %v411_v40, %v410_v38  ;;  %v424_v43 = vrot.slane %v423_v41, 2 }
  0x4a   : > { %v413_v44 = vrot.slane %v412_v42, 1  ;;  %v425_v45 = vadd.f32 %v424_v43, %v423_v41 }
  0x4c   : > { %518 = vperm.xlu0 %1326, %v512_v15   ;;  %523 = vperm.xlu1 %1327, %v513_v16   ;;  %v414_v46 = vadd.f32 %v413_v44, %v412_v42  ;;  %v426_v47 = vrot.slane %v425_v45, 1 }
  0x4e   : > { %v427_v48 = vadd.f32 %v426_v47, %v425_v45  ;;  %v428_v49 = vmul.f32 0.03125, %v414_v46 }
  0x50   : > { %528 = vperm.xlu0 %1326, %v514_v17   ;;  %533 = vperm.xlu1 %1327, %v515_v18   ;;  %v429_v50 = vmul.f32 0.03125, %v427_v48  ;;  %v430_v51 = vmul.f32 %v428_v49, %v428_v49  ;;  %v437_v54 = vsub.f32 %v397_v32, %v428_v49  ;;  %v436_v57 = vsub.f32 %v396_v28, %v428_v49  ;;  %v491_v17 = vld [vmem:[%s1647_s25 + $0x8] sm:$0xff]  ;;  %v1134_v28 = vld [vmem:[%s1916_s4 + $0x38] sm:$0xff] }
  0x51   : > { %v435_v0 = vsub.f32 %v395_v24, %v428_v49  ;;  %v434_v1 = vsub.f32 %v394_v23, %v428_v49  ;;  %v499_v23 = vld [vmem:[%s1916_s4 + $0x8] sm:$0xff]  ;;  %v1138_v32 = vld [vmem:[%s1916_s4 + $0x58] sm:$0xff] }
  0x52   : > { %v431_v52 = vsub.f32 %v429_v50, %v430_v51  ;;  %v1132_v24 = vld [vmem:[%s1916_s4 + $0x28] sm:$0xff] }
  0x54   : > { %763 = vperm.xlu0 %1326, %v1151_v19   ;;  %768 = vperm.xlu1 %1327, %v1152_v20   ;;  %v432_v53 = vadd.f32 1e-05, %v431_v52  ;;  %v490_v20 = vld [vmem:[%s1647_s25] sm:$0xff]  ;;  %s1364_s25 = scalar_lea.vmem %s1363_s15, 1024 }
  0x55   : > { %p1366_p5 = scmp.lt.s32.totalorder %s1364_s25, %s1358_s30 }
  0x56   : > { %1328 = vrsqrt.f32 %v432_v53 }
  0x57   : > { %p1367_p6 = por %p1366_p5, %p1365_p3 }
  0x58   : > { %773 = vperm.xlu0 %1326, %v1153_v21   ;;  %778 = vperm.xlu1 %1327, %v1154_v22  }
  0x59   : > { %p1368_p7 = pnand %p1367_p6, %p1361_p1 }
  0x63   : > { %v1329_v55 = vpop.eup %1328 }
  0x64   : > { %v441_v56 = vmul.f32 %v1329_v55, %v437_v54  ;;  %v440_v63 = vmul.f32 %v1329_v55, %v436_v57  ;;  %v439_v6 = vmul.f32 %v1329_v55, %v435_v0  ;;  %v438_v7 = vmul.f32 %v1329_v55, %v434_v1 }
  0xaf   : > { %v484_v58 = vpop.permute.xlu1 %483  ;;  %v460_v59 = vpop.permute.xlu0 %459 }
  0xb0   : > { %v465_v60 = vmul.f32 %v460_v59, %v441_v56 }
  0xb2   : > { %v489_v62 = vadd.f32 %v484_v58, %v465_v60 }
  0xb3   : > { %v455_v2 = vpop.permute.xlu0 %454  ;;  %v450_v3 = vpop.permute.xlu1 %449 }
  0xb4   : > { %v497_v4 = vadd.f32 %v493_v61, %v489_v62  ;;  %v464_v5 = vmul.f32 %v455_v2, %v440_v63  ;;  %v463_v12 = vmul.f32 %v450_v3, %v439_v6 }
  0xb6   : > { %1199 = vmatprep.subr.mxu0 %v497_v4  ;;  %1213 = vmatprep.subr.mxu1 %v497_v4 }
  0xb7   : > { %v479_v8 = vpop.permute.xlu0 %478  ;;  %v445_v9 = vpop.permute.xlu1 %444  ;;  %1200 = vmatpush3.msra.mxu0 %v497_v4  ;;  %1214 = vmatpush3.msra.mxu1 %v497_v4 }
  0xb8   : > { %v488_v11 = vadd.f32 %v479_v8, %v464_v5  ;;  %v462_v13 = vmul.f32 %v445_v9, %v438_v7 }
  0xba   : > { %v496_v14 = vadd.f32 %v492_v10, %v488_v11 }
  0xbb   : > { %v474_v15 = vpop.permute.xlu0 %473  ;;  %v469_v16 = vpop.permute.xlu1 %468 }
  0xbc   : > { %v487_v18 = vadd.f32 %v474_v15, %v463_v12  ;;  %v486_v19 = vadd.f32 %v469_v16, %v462_v13  ;;  %1201 = vmatprep.subr.mxu0 %v496_v14  ;;  %1215 = vmatprep.subr.mxu1 %v496_v14 }
  0xbd   : > { %1202 = vmatpush3.msra.mxu0 %v496_v14  ;;  %1216 = vmatpush3.msra.mxu1 %v496_v14 }
  0xbe   : > { %v495_v21 = vadd.f32 %v491_v17, %v487_v18  ;;  %v494_v22 = vadd.f32 %v490_v20, %v486_v19 }
  0xbf   : > { %v647_v33 = vpop.permute.xlu1 %646  ;;  %v642_v34 = vpop.permute.xlu0 %641 }
  0xc0   : > { %1203 = vmatprep.subr.mxu0 %v495_v21  ;;  %1217 = vmatprep.subr.mxu1 %v495_v21 }
  0xc1   : > { %1204 = vmatpush3.msra.mxu0 %v495_v21  ;;  %1218 = vmatpush3.msra.mxu1 %v495_v21 }
  0xc2   : > { %1205 = vmatprep.subr.mxu0 %v494_v22  ;;  %1219 = vmatprep.subr.mxu1 %v494_v22 }
  0xc3   : > { %1206 = vmatpush3.msra.mxu0 %v494_v22  ;;  %1220 = vmatpush3.msra.mxu1 %v494_v22  ;;  %v657_v35 = vpop.permute.xlu1 %656  ;;  %v652_v36 = vpop.permute.xlu0 %651 }
  0xc4   : > { %1208 = vmatmul.mubr.msk.f32.vlgmr.msra.gmra.mxu0 %vm536_vm0, %v499_v23  ;;  %1222 = vmatmul.mubr.msk.f32.vlgmr.msra.gmra.mxu1 %vm536_vm0, %v1132_v24 }
  0xc5   : > { %1227 = vmatprep.subr.mxu0 %v489_v62  ;;  %1241 = vmatprep.subr.mxu1 %v489_v62 }
  0xc6   : > { %1228 = vmatpush3.msra.mxu0 %v489_v62  ;;  %1245 = vmatpush3.msra.mxu1 %v489_v62 }
  0xc7   : > { %1229 = vmatprep.subr.mxu0 %v488_v11  ;;  %1242 = vmatprep.subr.mxu1 %v488_v11  ;;  %v524_v37 = vpop.permute.xlu1 %523  ;;  %v519_v38 = vpop.permute.xlu0 %518 }
  0xc8   : > { %1210 = vmatprep.mubr.msk.f32.mxu0 %vm536_vm0, %v500_v25  ;;  %1224 = vmatprep.mubr.msk.f32.mxu1 %vm536_vm0, %v1133_v26 }
  0xc9   : > { %1230 = vmatpush3.msra.mxu0 %v488_v11  ;;  %1246 = vmatpush3.msra.mxu1 %v488_v11 }
  0xca   : > { %1211 = vmatmul.mubr.msk.f32.gmra.mxu0 %vm536_vm0, %v501_v27  ;;  %1225 = vmatmul.mubr.msk.f32.gmra.mxu1 %vm536_vm0, %v1134_v28 }
  0xcb   : > { %1231 = vmatprep.subr.mxu0 %v487_v18  ;;  %1243 = vmatprep.subr.mxu1 %v487_v18  ;;  %v534_v39 = vpop.permute.xlu1 %533  ;;  %v529_v42 = vpop.permute.xlu0 %528 }
  0xcc   : > { %1232 = vmatpush3.msra.mxu0 %v487_v18  ;;  %1247 = vmatpush3.msra.mxu1 %v487_v18 }
  0xcd   : > { %1233 = vmatprep.subr.mxu0 %v486_v19  ;;  %1244 = vmatprep.subr.mxu1 %v486_v19 }
  0xce   : > { %1234 = vmatpush3.msra.mxu0 %v486_v19  ;;  %1248 = vmatpush3.msra.mxu1 %v486_v19 }
  0xcf   : > { %1235 = vmatprep.mubr.msk.f32.mxu0 %vm536_vm0, %v1135_v29  ;;  %1238 = vmatprep.mubr.msk.f32.mxu1 %vm536_vm0, %v1137_v30  ;;  %v769_v49 = vpop.permute.xlu1 %768  ;;  %v1778_v52 = vpop.permute.xlu0 %763 }
  0xd0   : > { %1236 = vmatmul.mubr.msk.f32.vlgmr.msra.gmra.mxu0 %vm536_vm0, %v1136_v31  ;;  %1239 = vmatmul.mubr.msk.f32.vlgmr.msra.gmra.mxu1 %vm536_vm0, %v1138_v32 }
  0xd3   : > { %v779_v59 = vpop.permute.xlu1 %778 }
 0x184   : > { %v1209_v40 = vpop.f32.mrf.mxu0  ;;  %v1223_v41 = vpop.f32.mrf.mxu1 }
 0x185   : > { %v621_v43 = vadd.f32 %v1209_v40, %v524_v37  ;;  %v743_v44 = vadd.f32 %v1223_v41, %v647_v33 }
 0x186   : > { %v615_v45 = vpop.f32.mrf.mxu0  ;;  %v737_v46 = vpop.f32.mrf.mxu1 }
 0x187   : > { %879 = vst [vmem:[%s371_s13 + $0x8] sm:$0xff] %v621_v43  ;;  %883 = vst [vmem:[%s378_s16 + $0x8] sm:$0xff] %v743_v44  ;;  %v616_v47 = vadd.f32 %v615_v45, %v519_v38  ;;  %v738_v48 = vadd.f32 %v737_v46, %v642_v34 }
 0x189   : > { %878 = vst [vmem:[%s371_s13] sm:$0xff] %v616_v47  ;;  %882 = vst [vmem:[%s378_s16] sm:$0xff] %v738_v48 }
 0x18a   : > { %v1212_v50 = vpop.f32.mrf.mxu0  ;;  %v1226_v51 = vpop.f32.mrf.mxu1 }
 0x18b   : > { %v631_v53 = vadd.f32 %v1212_v50, %v534_v39  ;;  %v753_v54 = vadd.f32 %v1226_v51, %v657_v35 }
 0x18c   : > { %v625_v55 = vpop.f32.mrf.mxu0  ;;  %v747_v56 = vpop.f32.mrf.mxu1 }
 0x18d   : > { %881 = vst [vmem:[%s371_s13 + $0x18] sm:$0xff] %v631_v53  ;;  %885 = vst [vmem:[%s378_s16 + $0x18] sm:$0xff] %v753_v54  ;;  %v626_v57 = vadd.f32 %v625_v55, %v529_v42  ;;  %v748_v58 = vadd.f32 %v747_v56, %v652_v36 }
 0x18f   : > { %880 = vst [vmem:[%s371_s13 + $0x10] sm:$0xff] %v626_v57  ;;  %884 = vst [vmem:[%s378_s16 + $0x10] sm:$0xff] %v748_v58 }
 0x190   : > { %v1237_v60 = vpop.f32.mrf.mxu0  ;;  %v1240_v61 = vpop.f32.mrf.mxu1 }
 0x191   : > { %1371 = shalt.err (!%p1368_p7)
}
 0x192   : > { %s1372_s19 = scalar_lea.hbm %s1786_s17, 512  ;;  %s1376_s24 = scalar_lea.hbm %s1919_s7, 1024 }
 0x193   : > { %p1373_p10 = scmp.ne.s32.totalorder %s1786_s17, %s1372_s19  ;;  %p1377_p2 = scmp.lt.s32.totalorder %s1786_s17, %s1919_s7 }
 0x194   : > { %p1378_p8 = scmp.lt.s32.totalorder %s1376_s24, %s1372_s19 }
 0x195   : > { %p1374_p4 = pnand %p1373_p10, %p1605_p9 }
 0x196   : > { %p1379_p12 = por %p1378_p8, %p1377_p2 }
 0x197   : > { %p1375_p13 = pneg %p1374_p4 }
 0x199   : > { %p1380_p0 = pnand %p1379_p12, %p1375_p13 }
 0x19b   : > { %1383 = shalt.err (!%p1380_p0)
}
 0x19c   : > { %s1501_s30 = smov 128   ;;  %s1502_s15 = smov 8   ;;  %v774_v62 = vpop.permute.xlu0 %773  ;;  %v865_v63 = vadd.f32 %v1237_v60, %v769_v49  ;;  %v875_v0 = vadd.f32 %v1240_v61, %v779_v59 }
 0x19d   : > { %1252 = dma.vmem_to_hbm [thread:$0]  (%p1605_p9), %s1780_s14, 512, %s1786_s17, %s1798_s0, %s1501_s30, %s1501_s30, %s1502_s15  }
 0x19e   : > { %s891_s12 = scalar_lea.sflag [#allocation4], %s1640_s9  ;;  %s1384_s25 = scalar_lea.vmem %s1773_s26, 512 }
 0x19f   : > { %p1385_p1 = scmp.ne.s32.totalorder %s1773_s26, %s1384_s25  ;;  %s1503_s19 = smov [#allocation5]  }
 0x1a0   : > { %s1388_s13 = sshll.u32 %s1503_s19, 4  ;;  %s1389_s13 = int_to_ptr.vmem [resolvable:$false] %s1388_s13 }
 0x1a1   : > { %p1386_p3 = pnand %p1385_p1, %p1605_p9  ;;  %s1390_s16 = scalar_lea.vmem %s1389_s13, 1024 }
 0x1a2   : > { %p1391_p6 = scmp.lt.s32.totalorder %s1773_s26, %s1389_s13  ;;  %p1392_p7 = scmp.lt.s32.totalorder %s1390_s16, %s1384_s25 }
 0x1a3   : > { %p1387_p5 = pneg %p1386_p3 }
 0x1a4   : > { %p1393_p10 = por %p1392_p7, %p1391_p6 }
 0x1a6   : > { %p1394_p4 = pnand %p1393_p10, %p1387_p5 }
 0x1a8   : > { %1397 = shalt.err (!%p1394_p4)
}
 0x1a9   : > { %s1398_s14 = scalar_lea.hbm %s1792_s21, 512  ;;  %s1402_s24 = scalar_lea.hbm %s1918_s6, 1024 }
 0x1aa   : > { %p1399_p13 = scmp.ne.s32.totalorder %s1792_s21, %s1398_s14  ;;  %p1403_p12 = scmp.lt.s32.totalorder %s1792_s21, %s1918_s6 }
 0x1ab   : > { %p1404_p0 = scmp.lt.s32.totalorder %s1402_s24, %s1398_s14 }
 0x1ac   : > { %p1400_p2 = pnand %p1399_p13, %p1605_p9 }
 0x1ad   : > { %p1405_p1 = por %p1404_p0, %p1403_p12 }
 0x1ae   : > { %p1401_p8 = pneg %p1400_p2 }
 0x1b0   : > { %p1406_p3 = pnand %p1405_p1, %p1401_p8 }
 0x1b2   : > { %1409 = shalt.err (!%p1406_p3)
}
 0x1b3   : > { %1251 = dma.vmem_to_hbm [thread:$0]  (%p1605_p9), %s1773_s26, 512, %s1792_s21, %s891_s12, %s1501_s30, %s1501_s30, %s1502_s15   ;;  %v859_v1 = vpop.f32.mrf.mxu0  ;;  %v869_v2 = vpop.f32.mrf.mxu1 }
 0x1b4   : > { %887 = vst [vmem:[%s1795_s23 + $0x8] sm:$0xff] %v865_v63  ;;  %s1934_s25 = sshll.u32 %s1795_s23, 4  ;;  %889 = vst [vmem:[%s1795_s23 + $0x18] sm:$0xff] %v875_v0  ;;  %v860_v3 = vadd.f32 %v859_v1, %v1778_v52  ;;  %v870_v4 = vadd.f32 %v869_v2, %v774_v62  ;;  %s1859_s14 = scalar_lea.hbm %s1920_s8, %s1776_s22  ;;  %s1851_s25 = int_to_ptr.vmem [resolvable:$true] %s1934_s25 }
 0x1b5   : > { %s1410_s26 = scalar_lea.vmem %s1851_s25, 512  ;;  %s1504_s21 = smov [#allocation8]  }
 0x1b6   : > { %886 = vst [vmem:[%s1795_s23] sm:$0xff] %v860_v3  ;;  %888 = vst [vmem:[%s1795_s23 + $0x10] sm:$0xff] %v870_v4  ;;  %p1411_p5 = scmp.ne.s32.totalorder %s1851_s25, %s1410_s26  ;;  %s1414_s12 = sshll.u32 %s1504_s21, 4  ;;  %s1415_s12 = int_to_ptr.vmem [resolvable:$false] %s1414_s12 }
 0x1b7   : > { %s1416_s9 = scalar_lea.vmem %s1415_s12, 1024  ;;  %p1417_p10 = scmp.lt.s32.totalorder %s1851_s25, %s1415_s12 }
 0x1b8   : > { %p1412_p6 = pnand %p1411_p5, %p1605_p9  ;;  %p1418_p4 = scmp.lt.s32.totalorder %s1416_s9, %s1410_s26 }
 0x1ba   : > { %p1413_p7 = pneg %p1412_p6  ;;  %p1419_p13 = por %p1418_p4, %p1417_p10 }
 0x1bc   : > { %p1420_p2 = pnand %p1419_p13, %p1413_p7 }
 0x1be   : > { %1423 = shalt.err (!%p1420_p2)
}
 0x1bf   : > { %s1424_s22 = scalar_lea.hbm %s1859_s14, 512  ;;  %s1428_s24 = scalar_lea.hbm %s1920_s8, 1024 }
 0x1c0   : > { %p1425_p8 = scmp.ne.s32.totalorder %s1859_s14, %s1424_s22  ;;  %p1429_p1 = scmp.lt.s32.totalorder %s1859_s14, %s1920_s8 }
 0x1c1   : > { %p1430_p3 = scmp.lt.s32.totalorder %s1428_s24, %s1424_s22 }
 0x1c2   : > { %p1426_p12 = pnand %p1425_p8, %p1605_p9 }
 0x1c3   : > { %p1431_p5 = por %p1430_p3, %p1429_p1 }
 0x1c4   : > { %p1427_p0 = pneg %p1426_p12 }
 0x1c6   : > { %p1432_p6 = pnand %p1431_p5, %p1427_p0 }
 0x1c8   : > { %1435 = shalt.err (!%p1432_p6)
}
 0x1c9   : > { %1253 = dma.vmem_to_hbm [thread:$0]  (%p1605_p9), %s1851_s25, 512, %s1859_s14, %s1798_s0, %s1501_s30, %s1501_s30, %s1502_s15  }
 0x1ca PF: > { %s964_s13 = sand.u32 1, %s1474_s27   ;;  %p1935_p7 = scmp.ge.s32.totalorder %s1494_s10, 2 }
 0x1cb   : > { %s965_s16 = scalar_lea.sflag [#allocation4], %s964_s13 }
 0x1cc   : > { %p1262_p10 = pnand %p1935_p7, %p1614_p11 }
 0x1ce   : > { %p1263_p4 = pneg %p1262_p10 }
 0x1d0   : > { %1465 = dma.done.wait (%p1263_p4), %s965_s16, 512  }
 0x1d1   : > { %1467 = vsyncadd (%p1263_p4), %s965_s16, 4294966784  ;;  %s1936_s18 = sadd.s32 4294967294, %s1494_s10  }
 0x1d2   : > { %s973_s26 = sand.u32 1, %s1936_s18  }
 0x1d3   : > { %s974_s21 = scalar_lea.sflag [#allocation7], %s973_s26 }
 0x1d4   : > { %1469 = dma.done.wait (%p1263_p4), %s974_s21, 1024  }
 0x1d5   : > { %1471 = vsyncadd (%p1263_p4), %s974_s21, 4294966272  ;;  %s28_s10 = sadd.s32 1, %s1494_s10   ;;  %s1937_s0 = sld [smem:[#allocation14_spill]] }
 0x1d6   : > { %p25_p9 = scmp.ge.s32.totalorder %s28_s10, 4   ;;  %s1938_s30 = sld [smem:[#allocation12_spill]] }
 0x1d7   : > { %s1939_s9 = sld [smem:[#allocation13_spill]]  ;;  %s1940_s27 = smov %s1478_s28 }
 0x1d8   : > { %s1941_s28 = smov %s1482_s29  ;;  %27 = sbr.rel (!%p25_p9) target bundleno = 10 (0xa), region = 128 }
 0x1db   : > { %s1942_s29 = smov %s1937_s0 }
 0x1dd   :  { %988 = vsyncpa [#allocation3], 1 }
 0x1de   :  { %990 = vsyncpa [#allocation3 + $0x1], 1 }
 0x1df   :  { %991 = vsyncpa [#allocation4], 1 }
 0x1e0   :  { %993 = vsyncpa [#allocation4 + $0x1], 1 }
 0x1e1   :  { %994 = vsyncpa [#allocation7], 1 }
 0x1e2   :  { %996 = vsyncpa [#allocation7 + $0x1], 1 }

</bundles_post_ra>
